<compile_context>
chip_gen: v7x
topology: tpu7x:2x2x1
jax: 0.10.0
libtpu: 0.0.40
codegen_flags: <defaults>
</compile_context>

<pallas_src>
import functools

import jax
import jax.numpy as jnp
from jax.experimental import pallas as pl
from jax.experimental.pallas import tpu as pltpu

_LANE = 128
_SUBLANE = 8


def _round_up(x: int, m: int) -> int:
    return (x + m - 1) // m * m


def _fused_mlp_kernel(*refs, n_layers: int, compute_dtype):
    """refs = (x_ref, w1_ref, b1_ref, ..., wN_ref, bN_ref, o_ref).

    Whole network in VMEM: MXU matmul per layer (f32 accumulation), f32 bias
    add + ReLU on the VPU for hidden layers, plain Linear for the last layer.
    """
    x_ref, o_ref = refs[0], refs[-1]
    h = x_ref[...]
    for i in range(n_layers):
        w_ref = refs[1 + 2 * i]
        b_ref = refs[2 + 2 * i]
        y = jnp.dot(h.astype(compute_dtype), w_ref[...].astype(compute_dtype),
                    preferred_element_type=jnp.float32)
        y = y + b_ref[...]            # (1, Dout) broadcasts over rows, in f32
        if i != n_layers - 1:
            y = jnp.maximum(y, 0.0)   # f32 elementwise on the VPU (v5e-safe)
        h = y
    o_ref[...] = h.astype(o_ref.dtype)


def _vmem_estimate_bytes(tm, dims, compute_itemsize):
    """Rough VMEM footprint of the fused design for one grid step."""
    n_layers = len(dims) - 1
    d_in, d_out = dims[0], dims[-1]
    # Weights (compute dtype) + biases (f32); x2 because Pallas double-buffers
    # by default even for constant block indices (Buffered(1) halves the big ones).
    w_bytes = 2 * sum(dims[i] * dims[i + 1] * compute_itemsize + dims[i + 1] * 4
                      for i in range(n_layers))
    io_bytes = 2 * tm * d_in * compute_itemsize + 2 * tm * d_out * 4
    act_bytes = sum(tm * dims[i + 1] * 4 for i in range(n_layers))
    return w_bytes + io_bytes + act_bytes


def mlp_forward(params, x, *, squeeze_output: bool = False,
                compute_dtype=jnp.bfloat16, max_batch_tile: int = 2048):
    """Fused MLP forward. params: list of (W[in,out], b[out]); x: [B, Din].

    Matches PyTorch MLP(dims, activation_fn=nn.ReLU, output_activation_fn=None,
    squeeze_output=squeeze_output, dropout=0.0): Linear+ReLU on hidden layers,
    plain Linear at the end, optional Squeeze(-1).
    """
    B, Din = x.shape
    n_layers = len(params)
    dims = [Din] + [w.shape[1] for (w, _) in params]
    d_out = dims[-1]
    if squeeze_output and d_out != 1:
        raise ValueError("Last dim must be 1 when squeezing")

    compute_itemsize = jnp.dtype(compute_dtype).itemsize
    ws, bs = [], []
    for (w, b) in params:
        ws.append(w.astype(compute_dtype))               # halves W DMA in bf16
        bs.append(b.reshape(1, -1).astype(jnp.float32))  # bias/ReLU stay f32

    # --- Batch tiling: balanced tile (mult of 8) minimizing padded rows. ---
    n_tiles = pl.cdiv(B, max_batch_tile)
    tm = _round_up(pl.cdiv(B, n_tiles), _SUBLANE)

    # --- VMEM budget guard (v7x has 64 MiB physical; stay well under). ---
    vmem_budget = 48 << 20
    while _vmem_estimate_bytes(tm, dims, compute_itemsize) > vmem_budget and tm > _SUBLANE:
        tm = max(_SUBLANE, _round_up(tm // 2, _SUBLANE))
    # TODO(synk): if the resident weights alone exceed the budget, fall back to
    # a per-layer K/N-tiled pipeline (emit_pipeline / extra grid axis) instead
    # of the all-weights-resident design (not needed at these dims).
    vmem_est = _vmem_estimate_bytes(tm, dims, compute_itemsize)
    vmem_limit = int(max(32 << 20, min(vmem_budget, 2 * vmem_est)))

    b_pad = _round_up(B, tm)
    x_in = x.astype(compute_dtype)
    if b_pad != B:
        x_in = jnp.pad(x_in, ((0, b_pad - B), (0, 0)))
    grid = (b_pad // tm,)

    in_specs = [pl.BlockSpec((tm, Din), lambda i: (i, 0))]
    flat_inputs = [x_in]
    for w, b2 in zip(ws, bs):
        # Weight/bias block index is constant across the grid, so Pallas never
        # re-DMAs them; for wide layers also drop the second buffer to halve
        # their VMEM footprint (irrelevant for tiny default weights).
        w_kwargs = {}
        if int(w.size) * compute_itemsize > (1 << 20):
            w_kwargs = dict(pipeline_mode=pl.Buffered(1))
        in_specs.append(pl.BlockSpec(w.shape, lambda i: (0, 0), **w_kwargs))
        in_specs.append(pl.BlockSpec(b2.shape, lambda i: (0, 0)))
        flat_inputs += [w, b2]
    # Un-padded, contiguous (tm, d_out) output block: no 128x writeback blowup.
    out_spec = pl.BlockSpec((tm, d_out), lambda i: (i, 0))

    flops = 2 * b_pad * sum(dims[i] * dims[i + 1] for i in range(n_layers))
    bytes_accessed = sum(int(a.size) * a.dtype.itemsize for a in flat_inputs)
    bytes_accessed += b_pad * d_out * 4

    kernel = functools.partial(_fused_mlp_kernel, n_layers=n_layers,
                               compute_dtype=compute_dtype)
    out = pl.pallas_call(
        kernel,
        out_shape=jax.ShapeDtypeStruct((b_pad, d_out), jnp.float32),
        grid=grid,
        in_specs=in_specs,
        out_specs=out_spec,
        compiler_params=pltpu.CompilerParams(
            dimension_semantics=("parallel",),        # shards across TCs on v7x
            vmem_limit_bytes=vmem_limit),
        cost_estimate=pl.CostEstimate(flops=flops, transcendentals=0,
                                      bytes_accessed=bytes_accessed),
    )(*flat_inputs)

    # Padded batch rows hold bias-derived garbage (ReLU(0+b)); always slice.
    out = out[:B, :d_out]
    if squeeze_output:
        out = jnp.squeeze(out, axis=-1)   # Squeeze(-1), d_out == 1 asserted above
    return out


def init_mlp_params(key, dims):
    """Deterministic init mirroring nn.Linear(dims[i], dims[i+1]) shapes.

    PyTorch Linear weight is (out, in); we store the transpose (in, out) so
    each layer is y = x @ W + b.
    """
    params = []
    for i in range(len(dims) - 1):
        key, kw, kb = jax.random.split(key, 3)
        bound = 1.0 / jnp.sqrt(dims[i])
        w = jax.random.uniform(kw, (dims[i], dims[i + 1]),
                               minval=-bound, maxval=bound, dtype=jnp.float32)
        b = jax.random.uniform(kb, (dims[i + 1],),
                               minval=-bound, maxval=bound, dtype=jnp.float32)
        params.append((w, b))
    return params


def _ref_forward(params, x, compute_dtype, *, squeeze_output):
    """Pure-JAX reference of the same math (same per-layer compute dtype)."""
    h = x
    for i, (w, b) in enumerate(params):
        h = jnp.dot(h.astype(compute_dtype), w.astype(compute_dtype),
                    preferred_element_type=jnp.float32) + b
        if i != len(params) - 1:
            h = jnp.maximum(h, 0.0)
    if squeeze_output:
        h = jnp.squeeze(h, axis=-1)
    return h


if __name__ == "__main__":
    # MLP(dims=(32, 64, 64, 1), activation_fn=nn.ReLU, squeeze_output=True)
    dims = (32, 64, 64, 1)
    batch = 8

    key = jax.random.PRNGKey(0)
    key, kx = jax.random.split(key)
    x = jax.random.normal(kx, (batch, dims[0]), dtype=jnp.float32)
    params = init_mlp_params(key, dims)

    # Exact f32 path (matches the f32 reference math bit-for-bit-ish).
    out_f32 = jax.block_until_ready(
        mlp_forward(params, x, squeeze_output=True, compute_dtype=jnp.float32))
    assert out_f32.shape == (batch,), out_f32.shape
    assert out_f32.dtype == jnp.float32
    ref_f32 = _ref_forward(params, x, jnp.float32, squeeze_output=True)
    assert jnp.allclose(out_f32, ref_f32, atol=1e-5, rtol=1e-5)

    # Default bf16 MXU path: compare against a bf16 reference.
    out_bf16 = jax.block_until_ready(mlp_forward(params, x, squeeze_output=True))
    assert out_bf16.shape == (batch,)
    ref_bf16 = _ref_forward(params, x, jnp.bfloat16, squeeze_output=True)
    assert jnp.allclose(out_bf16, ref_bf16, atol=2e-2, rtol=2e-2)

    # Un-squeezed variant as a sanity check of the (B, d_out) output layout.
    out2 = jax.block_until_ready(
        mlp_forward(params, x, squeeze_output=False, compute_dtype=jnp.float32))
    assert out2.shape == (batch, 1)

    print("KERNEL_OK")
</pallas_src>

<mosaic_0001>
module attributes {stable_mosaic.version = 11 : i64} {
  func.func @_fused_mlp_kernel(%arg0: i32, %arg1: memref<8x32xf32, #tpu.memory_space<vmem>>, %arg2: memref<32x64xf32, #tpu.memory_space<vmem>>, %arg3: memref<1x64xf32, #tpu.memory_space<vmem>>, %arg4: memref<64x64xf32, #tpu.memory_space<vmem>>, %arg5: memref<1x64xf32, #tpu.memory_space<vmem>>, %arg6: memref<64x1xf32, #tpu.memory_space<vmem>>, %arg7: memref<1x1xf32, #tpu.memory_space<vmem>>, %arg8: memref<8x1xf32, #tpu.memory_space<vmem>>) attributes {dimension_semantics = [#tpu.dimension_semantics<parallel>], iteration_bounds = array<i64: 1>, scalar_prefetch = 0 : i64, scratch_operands = 0 : i64, tpu.core_type = #tpu.core_type<tc>, window_params = [{transform_indices = @transform_0, window_bounds = array<i64: 8, 32>}, {pipeline_mode = #tpu.pipeline_mode<synchronous>, transform_indices = @transform_1, window_bounds = array<i64: 32, 64>}, {pipeline_mode = #tpu.pipeline_mode<synchronous>, transform_indices = @transform_2, window_bounds = array<i64: 1, 64>}, {pipeline_mode = #tpu.pipeline_mode<synchronous>, transform_indices = @transform_3, window_bounds = array<i64: 64, 64>}, {pipeline_mode = #tpu.pipeline_mode<synchronous>, transform_indices = @transform_4, window_bounds = array<i64: 1, 64>}, {pipeline_mode = #tpu.pipeline_mode<synchronous>, transform_indices = @transform_5, window_bounds = array<i64: 64, 1>}, {pipeline_mode = #tpu.pipeline_mode<synchronous>, transform_indices = @transform_6, window_bounds = array<i64: 1, 1>}, {transform_indices = @transform_7, window_bounds = array<i64: 8, 1>}]} {
    %c0 = arith.constant 0 : index
    %c0_0 = arith.constant 0 : index
    %0 = vector.load %arg1[%c0, %c0_0] : memref<8x32xf32, #tpu.memory_space<vmem>>, vector<8x32xf32>
    %c0_1 = arith.constant 0 : index
    %c0_2 = arith.constant 0 : index
    %1 = vector.load %arg2[%c0_1, %c0_2] : memref<32x64xf32, #tpu.memory_space<vmem>>, vector<32x64xf32>
    %cst = arith.constant dense<0.000000e+00> : vector<8x64xf32>
    %2 = tpu.matmul %0, %1, %cst {dimension_numbers = #tpu.dot_dimension_numbers<[1], [0], [0], [1], [0, 0, 1, 1], [], []>} : vector<8x32xf32>, vector<32x64xf32>, vector<8x64xf32> -> vector<8x64xf32>
    %c0_3 = arith.constant 0 : index
    %c0_4 = arith.constant 0 : index
    %3 = vector.load %arg3[%c0_3, %c0_4] : memref<1x64xf32, #tpu.memory_space<vmem>>, vector<1x64xf32>
    %4 = vector.broadcast %3 : vector<1x64xf32> to vector<8x64xf32>
    %5 = arith.addf %2, %4 : vector<8x64xf32>
    %cst_5 = arith.constant 0.000000e+00 : f32
    %6 = vector.broadcast %cst_5 : f32 to vector<8x64xf32>
    %7 = arith.maximumf %5, %6 : vector<8x64xf32>
    %c0_6 = arith.constant 0 : index
    %c0_7 = arith.constant 0 : index
    %8 = vector.load %arg4[%c0_6, %c0_7] : memref<64x64xf32, #tpu.memory_space<vmem>>, vector<64x64xf32>
    %cst_8 = arith.constant dense<0.000000e+00> : vector<8x64xf32>
    %9 = tpu.matmul %7, %8, %cst_8 {dimension_numbers = #tpu.dot_dimension_numbers<[1], [0], [0], [1], [0, 0, 1, 1], [], []>} : vector<8x64xf32>, vector<64x64xf32>, vector<8x64xf32> -> vector<8x64xf32>
    %c0_9 = arith.constant 0 : index
    %c0_10 = arith.constant 0 : index
    %10 = vector.load %arg5[%c0_9, %c0_10] : memref<1x64xf32, #tpu.memory_space<vmem>>, vector<1x64xf32>
    %11 = vector.broadcast %10 : vector<1x64xf32> to vector<8x64xf32>
    %12 = arith.addf %9, %11 : vector<8x64xf32>
    %cst_11 = arith.constant 0.000000e+00 : f32
    %13 = vector.broadcast %cst_11 : f32 to vector<8x64xf32>
    %14 = arith.maximumf %12, %13 : vector<8x64xf32>
    %c0_12 = arith.constant 0 : index
    %c0_13 = arith.constant 0 : index
    %15 = vector.load %arg6[%c0_12, %c0_13] : memref<64x1xf32, #tpu.memory_space<vmem>>, vector<64x1xf32>
    %cst_14 = arith.constant dense<0.000000e+00> : vector<8x1xf32>
    %16 = tpu.matmul %14, %15, %cst_14 {dimension_numbers = #tpu.dot_dimension_numbers<[1], [0], [0], [1], [0, 0, 1, 1], [], []>} : vector<8x64xf32>, vector<64x1xf32>, vector<8x1xf32> -> vector<8x1xf32>
    %c0_15 = arith.constant 0 : index
    %c0_16 = arith.constant 0 : index
    %17 = vector.load %arg7[%c0_15, %c0_16] : memref<1x1xf32, #tpu.memory_space<vmem>>, vector<1x1xf32>
    %18 = vector.broadcast %17 : vector<1x1xf32> to vector<8x1xf32>
    %19 = arith.addf %16, %18 : vector<8x1xf32>
    %c0_17 = arith.constant 0 : index
    %c0_18 = arith.constant 0 : index
    %20 = vector.load %arg8[%c0_17, %c0_18] : memref<8x1xf32, #tpu.memory_space<vmem>>, vector<8x1xf32>
    tpu.vector_store %arg8[%c0_17, %c0_18], %19 {strides = array<i32>} : memref<8x1xf32, #tpu.memory_space<vmem>>, vector<8x1xf32>,
    return
  }
  func.func @transform_0(%arg0: i32) -> (i32, i32) {
    %c0_i32 = arith.constant 0 : i32
    %c0_i32_0 = arith.constant 0 : i32
    return %arg0, %c0_i32 : i32, i32
  }
  func.func @transform_1(%arg0: i32) -> (i32, i32) {
    %c0_i32 = arith.constant 0 : i32
    %c0_i32_0 = arith.constant 0 : i32
    %c0_i32_1 = arith.constant 0 : i32
    return %c0_i32, %c0_i32_0 : i32, i32
  }
  func.func @transform_2(%arg0: i32) -> (i32, i32) {
    %c0_i32 = arith.constant 0 : i32
    %c0_i32_0 = arith.constant 0 : i32
    %c0_i32_1 = arith.constant 0 : i32
    return %c0_i32, %c0_i32_0 : i32, i32
  }
  func.func @transform_3(%arg0: i32) -> (i32, i32) {
    %c0_i32 = arith.constant 0 : i32
    %c0_i32_0 = arith.constant 0 : i32
    %c0_i32_1 = arith.constant 0 : i32
    return %c0_i32, %c0_i32_0 : i32, i32
  }
  func.func @transform_4(%arg0: i32) -> (i32, i32) {
    %c0_i32 = arith.constant 0 : i32
    %c0_i32_0 = arith.constant 0 : i32
    %c0_i32_1 = arith.constant 0 : i32
    return %c0_i32, %c0_i32_0 : i32, i32
  }
  func.func @transform_5(%arg0: i32) -> (i32, i32) {
    %c0_i32 = arith.constant 0 : i32
    %c0_i32_0 = arith.constant 0 : i32
    %c0_i32_1 = arith.constant 0 : i32
    return %c0_i32, %c0_i32_0 : i32, i32
  }
  func.func @transform_6(%arg0: i32) -> (i32, i32) {
    %c0_i32 = arith.constant 0 : i32
    %c0_i32_0 = arith.constant 0 : i32
    %c0_i32_1 = arith.constant 0 : i32
    return %c0_i32, %c0_i32_0 : i32, i32
  }
  func.func @transform_7(%arg0: i32) -> (i32, i32) {
    %c0_i32 = arith.constant 0 : i32
    %c0_i32_0 = arith.constant 0 : i32
    return %arg0, %c0_i32 : i32, i32
  }
}

</mosaic_0001>

<bundles_post_ra>
// kernel: tpu_custom_call.1
= control target key start
LH: loop header
LB: loop body
LE: loop exit
PB: predicated region body
PF: predicated region fallthrough
CT: control target
= control target key end

     0   :  { %s576_s0 = inlined_call_operand.vmem [shape: f32[8,32], index: 0, kind: input, shape index: {}]   ;;  %s577_s1 = inlined_call_operand.hbm [shape: f32[32,64], index: 1, kind: input, shape index: {}]   ;;  %s578_s2 = inlined_call_operand.vmem [shape: f32[1,64], index: 2, kind: input, shape index: {}]   ;;  %s579_s3 = inlined_call_operand.vmem [shape: f32[64,64], index: 3, kind: input, shape index: {}]   ;;  %s580_s4 = inlined_call_operand.vmem [shape: f32[1,64], index: 4, kind: input, shape index: {}]   ;;  %s581_s5 = inlined_call_operand.vmem [shape: f32[64,1], index: 5, kind: input, shape index: {}]   ;;  %s582_s6 = inlined_call_operand.<no memory space> [shape: f32[1,1], index: 6, kind: input, shape index: {}]   ;;  %s583_s7 = inlined_call_operand.vmem [shape: f32[8,1], index: 7, kind: output, shape index: {}]  }
   0x1   :  { %v12_v0 = vstv %s582_s6 }
   0x2   :  { %13 = vst [vmem:[#allocation2] sm:$0x1] %v12_v0 }
   0x3   :  { %14 = vsyncpa [#allocation4], 0  ;;  %s452_s26 = smov [#allocation3]   ;;  %s428_s30 = scalar_lea.hbm %s577_s1, 512 }
   0x4   :  { %s22_s27 = sshll.u32 %s452_s26, 4  ;;  %p429_p0 = scmp.ne.s32.totalorder %s577_s1, %s428_s30  ;;  %s23_s27 = int_to_ptr.vmem [resolvable:$true] %s22_s27 }
   0x5   :  { %p432_p1 = scmp.lt.u32.totalorder %s428_s30, %s577_s1 }
   0x7   :  { %p434_p2 = pnand %p432_p1, %p429_p0 }
   0x9   :  { %437 = shalt.err (!%p434_p2)
}
   0xa   :  { %s438_s6 = scalar_lea.vmem %s23_s27, 512  ;;  %p443_p4 = scmp.lt.s32.totalorder %s23_s27, %s23_s27 }
   0xb   :  { %p439_p3 = scmp.ne.s32.totalorder %s23_s27, %s438_s6  ;;  %p444_p5 = scmp.lt.s32.totalorder %s438_s6, %s438_s6 }
   0xd   :  { %p445_p6 = por %p444_p5, %p443_p4 }
   0xf   :  { %p446_p7 = pnand %p445_p6, %p439_p3 }
  0x11   :  { %449 = shalt.err (!%p446_p7)
}
  0x12   :  { %s453_s12 = smov 128   ;;  %s454_s13 = smov 8  }
  0x13   :  { %28 = dma.hbm_to_vmem [thread:$0]  %s577_s1, 512, %s23_s27, [#allocation4], %s453_s12, %s453_s12, %s454_s13  }
  0x14   :  { %450 = dma.done.wait [#allocation4], 512  }
  0x15   :  { %451 = vsyncadd [#allocation4], 4294966784  ;;  %v455_v1 = vmov 0.0|0.0   ;;  %vm456_vm0 = vmmov 0   ;;  %v457_v2 = vmov 0.0   ;;  %v43_v3 = vld [vmem:[#allocation3] sm:$0xff] }
  0x16   :  { %392 = vmatprep.subr.bf16.mxu0 %v455_v1  ;;  %351 = vmatprep.mubr.msk.f32.mxu0 %vm456_vm0, %v457_v2  ;;  %v44_v4 = vld [vmem:[#allocation3 + $0x8] sm:$0xff]  ;;  %v45_v5 = vld [vmem:[#allocation3 + $0x10] sm:$0xff]  ;;  %v46_v7 = vld [vmem:[#allocation3 + $0x18] sm:$0xff]  ;;  %vm54_vm1 = vcmask 261120   ;;  %vm144_vm2 = vcmask 523264   ;;  %vm307_vm3 = vcmask 7168  }
  0x17   :  { %398 = vmatprep.subr.bf16.mxu1 %v455_v1  ;;  %370 = vmatprep.mubr.msk.f32.mxu1 %vm456_vm0, %v457_v2  ;;  %v393_v6 = vpack.c.bf16 %v44_v4, %v43_v3  ;;  %v129_v8 = vld [vmem:[%s579_s3] sm:$0xff]  ;;  %v130_v9 = vld [vmem:[%s579_s3 + $0x8] sm:$0xff]  ;;  %v131_v10 = vld [vmem:[%s579_s3 + $0x10] sm:$0xff]  ;;  %v396_v12 = vpack.c.bf16 %v46_v7, %v45_v5 }
  0x18   :  { %v132_v11 = vld [vmem:[%s579_s3 + $0x18] sm:$0xff]  ;;  %v399_v13 = vpack.c.bf16 %v130_v9, %v129_v8  ;;  %v133_v15 = vld [vmem:[%s579_s3 + $0x20] sm:$0xff]  ;;  %v134_v16 = vld [vmem:[%s579_s3 + $0x28] sm:$0xff] }
  0x19   :  { %394 = vmatpush3.bf16.msra.mxu0 %v393_v6  ;;  %v402_v14 = vpack.c.bf16 %v132_v11, %v131_v10  ;;  %v42_v17 = vld [vmem:[%s576_s0] sm:$0xff]  ;;  %v405_v18 = vpack.c.bf16 %v134_v16, %v133_v15  ;;  %v135_v19 = vld [vmem:[%s579_s3 + $0x30] sm:$0xff]  ;;  %v136_v20 = vld [vmem:[%s579_s3 + $0x38] sm:$0xff] }
  0x1a   :  { %395 = vmatprep.subr.bf16.mxu0 %v455_v1  ;;  %400 = vmatpush3.bf16.msra.mxu1 %v399_v13  ;;  %v408_v21 = vpack.c.bf16 %v136_v20, %v135_v19  ;;  %v219_v22 = vld [vmem:[%s581_s5] sm:$0xff]  ;;  %v220_v23 = vld [vmem:[%s581_s5 + $0x8] sm:$0xff]  ;;  %v221_v24 = vld [vmem:[%s581_s5 + $0x10] sm:$0xff] }
  0x1b   :  { %401 = vmatprep.subr.bf16.mxu1 %v455_v1  ;;  %v411_v25 = vpack.c.bf16 %v220_v23, %v219_v22  ;;  %v222_v26 = vld [vmem:[%s581_s5 + $0x18] sm:$0xff]  ;;  %v223_v28 = vld [vmem:[%s581_s5 + $0x20] sm:$0xff]  ;;  %v224_v29 = vld [vmem:[%s581_s5 + $0x28] sm:$0xff] }
  0x1c   :  { %v414_v27 = vpack.c.bf16 %v222_v26, %v221_v24  ;;  %v417_v30 = vpack.c.bf16 %v224_v29, %v223_v28  ;;  %v314_v31 = vld [vmem:[%s578_s2] ss:$0 sm:$0xff]  ;;  %v225_v36 = vld [vmem:[%s581_s5 + $0x30] sm:$0xff]  ;;  %v226_v37 = vld [vmem:[%s581_s5 + $0x38] sm:$0xff] }
  0x1d   :  { %397 = vmatpush3.bf16.msra.mxu0 %v396_v12  ;;  %v420_v38 = vpack.c.bf16 %v226_v37, %v225_v36  ;;  %v316_v39 = vld [vmem:[%s580_s4] ss:$0 sm:$0xff] }
  0x1e   :  { %410 = vmatprep.subr.bf16.mxu0 %v455_v1  ;;  %403 = vmatpush3.bf16.msra.mxu1 %v402_v14  ;;  %v318_v44 = vld [vmem:[#allocation2] ss:$0 sm:$0xff] }
  0x1f   :  { %404 = vmatprep.subr.bf16.mxu1 %v455_v1 }
  0x20   :  { %352 = vmatmul.mubr.msk.f32.vlgmr.msra.gmra.mrb[0].mxu0 %vm54_vm1, %v42_v17 }
  0x21   :  { %389 = vmatprep.mubr.msk.f32.mxu0 %vm456_vm0, %v457_v2  ;;  %412 = vmatpush3.bf16.msra.mxu0 %v411_v25 }
  0x22   :  { %406 = vmatpush3.bf16.msra.mxu1 %v405_v18  ;;  %413 = vmatprep.subr.bf16.mxu0 %v455_v1 }
  0x23   :  { %407 = vmatprep.subr.bf16.mxu1 %v455_v1 }
  0x25   :  { %415 = vmatpush3.bf16.msra.mxu0 %v414_v27 }
  0x26   :  { %409 = vmatpush3.bf16.msra.mxu1 %v408_v21  ;;  %416 = vmatprep.subr.bf16.mxu0 %v455_v1 }
  0x29   :  { %418 = vmatpush3.bf16.msra.mxu0 %v417_v30 }
  0x2a   :  { %419 = vmatprep.subr.bf16.mxu0 %v455_v1 }
  0x2d   :  { %421 = vmatpush3.bf16.msra.mxu0 %v420_v38 }
  0xf3   :  { %v124_v32 = vpop.f32.mrb[0].mxu0 }
  0xf4   :  { %v125_v33 = vadd.f32 %v314_v31, %v124_v32  ;;  %v353_v34 = vpop.f32.mrb[1].mxu0 }
  0xf6   :  { %v128_v35 = vmax.f32 %v125_v33, 0.0 }
  0xf8   :  { %371 = vmatmul.mubr.msk.f32.vlgmr.msra.gmra.mrb[0].mxu1 %vm144_vm2, %v128_v35 }
 0x1cb   :  { %v214_v40 = vpop.f32.mrb[0].mxu1 }
 0x1cc   :  { %v215_v41 = vadd.f32 %v316_v39, %v214_v40  ;;  %v372_v42 = vpop.f32.mrb[1].mxu1 }
 0x1ce   :  { %v218_v43 = vmax.f32 %v215_v41, 0.0 }
 0x1d0   :  { %390 = vmatmul.mubr.msk.f32.vlgmr.msra.gmra.mrb[2].mxu0 %vm144_vm2, %v218_v43 }
 0x2a3   :  { %v303_v45 = vpop.f32.mrb[2].mxu0 }
 0x2a4   :  { %v304_v46 = vadd.f32 %v318_v44, %v303_v45  ;;  %v391_v47 = vpop.f32.mrb[3].mxu0 }
 0x2a6   :  { %308 = vst.msk [vmem:[%s583_s7] sm:$0xff] %vm307_vm3, %v304_v46 }
 0x2a7   :  { %313 = vsyncpa [#allocation4], 1 }

</bundles_post_ra>
